<compile_context>
chip_gen: v7x
topology: tpu7x:2x2x1
jax: 0.10.0
libtpu: 0.0.40
codegen_flags: <defaults>
</compile_context>

<pallas_src>
import jax
import jax.numpy as jnp
from jax.experimental import pallas as pl
from jax.experimental.pallas import tpu as pltpu

LN_EPS = 1e-5  # nn.LayerNorm default


def domain_attention_kernel(params_ref, sp_ref, q_ref, out_ref):
    E = q_ref.shape[-1]

    g = params_ref[0:1, :]      # (1, E)  LayerNorm gamma
    bta = params_ref[1:2, :]    # (1, E)  LayerNorm beta
    w = params_ref[2:3, :]      # (1, E)  Linear weight (E -> 1)

    sp = sp_ref[...]            # (TB, 2E)
    s = sp[:, :E]               # (TB, E)
    p = sp[:, E:]               # (TB, E)
    q = q_ref[...]              # (TB, R, E)

    # --- LayerNorm(query) over the embedding axis ---
    mean = jnp.mean(q, axis=-1, keepdims=True)
    centered = q - mean
    var = jnp.mean(centered * centered, axis=-1, keepdims=True)
    qn = centered * jax.lax.rsqrt(var + LN_EPS) * g + bta    # (TB, R, E)

    s3 = s[:, None, :]          # (TB, 1, E)
    p3 = p[:, None, :]          # (TB, 1, E)

    # --- fused gated-linear logit difference ---
    # b_s - b_p = sum((relu(s*qn) - relu(p*qn)) * w); the Linear bias cancels
    # exactly in the 2-way softmax.  One lane reduction instead of two; stays
    # on VPU + XLU (shapes are far below MXU granularity).
    gated_diff = (jnp.maximum(s3 * qn, 0.0) - jnp.maximum(p3 * qn, 0.0)) * w
    delta = jnp.sum(gated_diff, axis=-1, keepdims=True)      # (TB, R, 1)

    # --- 2-way softmax == sigmoid of the logit difference (EUP) ---
    beta_s = jax.nn.sigmoid(delta)                           # (TB, R, 1)

    # --- z = beta_s * s + beta_p * p == p + beta_s * (s - p) ---
    out_ref[...] = p3 + beta_s * (s3 - p3)


def _pick_block_b(B, R, E):
    """Pick the batch-block size.

    Prefer the whole batch in a single grid step (no per-step pipeline
    overhead) when it fits a conservative VMEM budget; otherwise use the
    largest multiple-of-8 divisor of B that fits.  Budget accounts for
    double-buffered query + output tiles and the packed s/p tile, with the
    lane dim padded to 128 (VMEM layout)."""
    lane_e = max(E, 128)
    per_b = (2 * 2 * R * lane_e * 4          # query in + output, x2 buffers
             + 2 * max(2 * E, 128) * 4)      # packed s/p, x2 buffers
    budget = 8 << 20                         # well under v5e's 16 MiB default
    cap = max(1, budget // per_b)
    if B <= cap:
        return B
    if B % 8 != 0:
        return B                             # rare; fall back to one step
    tb = 8
    while tb * 2 <= cap and B % (tb * 2) == 0:
        tb *= 2
    return tb


def domain_attention_batched(s_u, p_u, query, ln_gamma, ln_beta, lin_w, lin_b,
                             *, block_b=None):
    """s_u, p_u: (B, E); query: (B, R, E); returns z_u: (B, R, E)."""
    B, R, E = query.shape
    f32 = jnp.float32

    s2 = s_u.reshape(B, E).astype(f32)
    p2 = p_u.reshape(B, E).astype(f32)
    sp = jnp.concatenate([s2, p2], axis=-1)                  # (B, 2E): one DMA stream
    q3 = query.astype(f32)

    # Pack the shared (E,) parameters into one 8-sublane VMEM tile.
    params = jnp.zeros((8, E), f32)
    params = params.at[0].set(ln_gamma.reshape(E).astype(f32))
    params = params.at[1].set(ln_beta.reshape(E).astype(f32))
    params = params.at[2].set(lin_w.reshape(E).astype(f32))
    del lin_b  # cancels exactly in sigmoid(b_s - b_p); not needed in-kernel

    if block_b is None:
        block_b = _pick_block_b(B, R, E)
    assert B % block_b == 0
    nb = B // block_b

    return pl.pallas_call(
        domain_attention_kernel,
        out_shape=jax.ShapeDtypeStruct((B, R, E), f32),
        grid=(nb,),
        in_specs=[
            pl.BlockSpec((8, E), lambda i: (0, 0)),              # shared params
            pl.BlockSpec((block_b, 2 * E), lambda i: (i, 0)),    # packed s/p
            pl.BlockSpec((block_b, R, E), lambda i: (i, 0, 0)),  # query
        ],
        out_specs=pl.BlockSpec((block_b, R, E), lambda i: (i, 0, 0)),
        compiler_params=pltpu.CompilerParams(
            dimension_semantics=("parallel",)),
    )(params, sp, q3)


def domain_attention(s_u, p_u, query, ln_gamma, ln_beta, lin_w, lin_b):
    """Single-instance forward matching the PyTorch module:
    s_u, p_u: (E,); query: (R, E); returns z_u: (R, E)."""
    R, E = query.shape
    out = domain_attention_batched(
        s_u.reshape(1, E), p_u.reshape(1, E), query.reshape(1, R, E),
        ln_gamma, ln_beta, lin_w, lin_b)
    return out[0]


def reference(s_u, p_u, query, ln_gamma, ln_beta, lin_w, lin_b):
    """Pure-JAX reference following the PyTorch forward literally."""
    mean = jnp.mean(query, axis=-1, keepdims=True)
    var = jnp.mean((query - mean) ** 2, axis=-1, keepdims=True)
    qn = (query - mean) / jnp.sqrt(var + LN_EPS) * ln_gamma + ln_beta
    b_s = jnp.maximum(s_u[None, :] * qn, 0.0) @ lin_w + lin_b[0]   # (R,)
    b_p = jnp.maximum(p_u[None, :] * qn, 0.0) @ lin_w + lin_b[0]   # (R,)
    beta_s = jnp.exp(b_s) / (jnp.exp(b_s) + jnp.exp(b_p))
    beta_p = jnp.exp(b_p) / (jnp.exp(b_s) + jnp.exp(b_p))
    return beta_s[:, None] * s_u[None, :] + beta_p[:, None] * p_u[None, :]


if __name__ == "__main__":
    embed_dim = 32   # E
    region_num = 8   # R
    batch = 16       # B (for the batched variant)

    key = jax.random.PRNGKey(0)
    ks = jax.random.split(key, 7)
    s_u = jax.random.normal(ks[0], (embed_dim,), jnp.float32)
    p_u = jax.random.normal(ks[1], (embed_dim,), jnp.float32)
    query = jax.random.normal(ks[2], (region_num, embed_dim), jnp.float32)

    # Parameters (nn.Linear(E,1) + nn.LayerNorm(E) shapes / default init).
    lin_w = jax.random.normal(ks[3], (embed_dim,), jnp.float32) / jnp.sqrt(embed_dim)
    lin_b = jax.random.normal(ks[4], (1,), jnp.float32) * 0.1
    ln_gamma = jnp.ones((embed_dim,), jnp.float32)
    ln_beta = jnp.zeros((embed_dim,), jnp.float32)

    # --- single-instance forward (matches the PyTorch module signature) ---
    z_u = domain_attention(s_u, p_u, query, ln_gamma, ln_beta, lin_w, lin_b)
    jax.block_until_ready(z_u)
    z_ref = reference(s_u, p_u, query, ln_gamma, ln_beta, lin_w, lin_b)
    assert z_u.shape == (region_num, embed_dim)
    assert jnp.allclose(z_u, z_ref, atol=2e-5, rtol=2e-5), \
        float(jnp.max(jnp.abs(z_u - z_ref)))

    # --- batched forward: many layer instances behind one 'parallel' grid ---
    s_b = jax.random.normal(ks[5], (batch, embed_dim), jnp.float32)
    p_b = jax.random.normal(ks[6], (batch, embed_dim), jnp.float32)
    q_b = jax.random.normal(jax.random.fold_in(key, 99),
                            (batch, region_num, embed_dim), jnp.float32)
    z_b_ref = jax.vmap(reference, in_axes=(0, 0, 0, None, None, None, None))(
        s_b, p_b, q_b, ln_gamma, ln_beta, lin_w, lin_b)

    # 1) auto block size: whole batch in one grid step (no per-step overhead).
    z_b = domain_attention_batched(s_b, p_b, q_b, ln_gamma, ln_beta,
                                   lin_w, lin_b)
    jax.block_until_ready(z_b)
    assert z_b.shape == (batch, region_num, embed_dim)
    assert jnp.allclose(z_b, z_b_ref, atol=2e-5, rtol=2e-5), \
        float(jnp.max(jnp.abs(z_b - z_b_ref)))

    # 2) explicit smaller block: exercises the multi-step pipelined grid path.
    z_b2 = domain_attention_batched(s_b, p_b, q_b, ln_gamma, ln_beta,
                                    lin_w, lin_b, block_b=8)
    jax.block_until_ready(z_b2)
    assert jnp.allclose(z_b2, z_b_ref, atol=2e-5, rtol=2e-5), \
        float(jnp.max(jnp.abs(z_b2 - z_b_ref)))

    print("KERNEL_OK")
</pallas_src>

<mosaic_0001>
module attributes {stable_mosaic.version = 11 : i64} {
  func.func @domain_attention_kernel(%arg0: i32, %arg1: memref<8x32xf32, #tpu.memory_space<vmem>>, %arg2: memref<1x64xf32, #tpu.memory_space<vmem>>, %arg3: memref<1x8x32xf32, #tpu.memory_space<vmem>>, %arg4: memref<1x8x32xf32, #tpu.memory_space<vmem>>) attributes {dimension_semantics = [#tpu.dimension_semantics<parallel>], iteration_bounds = array<i64: 1>, scalar_prefetch = 0 : i64, scratch_operands = 0 : i64, tpu.core_type = #tpu.core_type<tc>, window_params = [{pipeline_mode = #tpu.pipeline_mode<synchronous>, transform_indices = @transform_0, window_bounds = array<i64: 8, 32>}, {transform_indices = @transform_1, window_bounds = array<i64: 1, 64>}, {transform_indices = @transform_2, window_bounds = array<i64: 1, 8, 32>}, {transform_indices = @transform_3, window_bounds = array<i64: 1, 8, 32>}]} {
    %c0 = arith.constant 0 : index
    %c0_0 = arith.constant 0 : index
    %0 = vector.load %arg1[%c0, %c0_0] : memref<8x32xf32, #tpu.memory_space<vmem>>, vector<1x32xf32>
    %c1 = arith.constant 1 : index
    %c0_1 = arith.constant 0 : index
    %1 = vector.load %arg1[%c1, %c0_1] : memref<8x32xf32, #tpu.memory_space<vmem>>, vector<1x32xf32>
    %c2 = arith.constant 2 : index
    %c0_2 = arith.constant 0 : index
    %2 = vector.load %arg1[%c2, %c0_2] : memref<8x32xf32, #tpu.memory_space<vmem>>, vector<1x32xf32>
    %c0_3 = arith.constant 0 : index
    %c0_4 = arith.constant 0 : index
    %3 = vector.load %arg2[%c0_3, %c0_4] : memref<1x64xf32, #tpu.memory_space<vmem>>, vector<1x64xf32>
    %4 = vector.extract_strided_slice %3 {offsets = [0, 0], sizes = [1, 32], strides = [1, 1]} : vector<1x64xf32> to vector<1x32xf32>
    %5 = vector.extract_strided_slice %3 {offsets = [0, 32], sizes = [1, 32], strides = [1, 1]} : vector<1x64xf32> to vector<1x32xf32>
    %c0_5 = arith.constant 0 : index
    %c0_6 = arith.constant 0 : index
    %c0_7 = arith.constant 0 : index
    %6 = vector.load %arg3[%c0_5, %c0_6, %c0_7] : memref<1x8x32xf32, #tpu.memory_space<vmem>>, vector<1x8x32xf32>
    %cst = arith.constant dense<0.000000e+00> : vector<1x8xf32>
    %7 = vector.multi_reduction <add>, %6, %cst [2] : vector<1x8x32xf32> to vector<1x8xf32>
    %8 = vector.shape_cast %7 : vector<1x8xf32> to vector<1x8x1xf32>
    %cst_8 = arith.constant 3.200000e+01 : f32
    %9 = vector.broadcast %cst_8 : f32 to vector<1x8x1xf32>
    %10 = arith.divf %8, %9 : vector<1x8x1xf32>
    %11 = vector.broadcast %10 : vector<1x8x1xf32> to vector<1x8x32xf32>
    %12 = arith.subf %6, %11 : vector<1x8x32xf32>
    %13 = arith.mulf %12, %12 : vector<1x8x32xf32>
    %cst_9 = arith.constant dense<0.000000e+00> : vector<1x8xf32>
    %14 = vector.multi_reduction <add>, %13, %cst_9 [2] : vector<1x8x32xf32> to vector<1x8xf32>
    %15 = vector.shape_cast %14 : vector<1x8xf32> to vector<1x8x1xf32>
    %cst_10 = arith.constant 3.200000e+01 : f32
    %16 = vector.broadcast %cst_10 : f32 to vector<1x8x1xf32>
    %17 = arith.divf %15, %16 : vector<1x8x1xf32>
    %cst_11 = arith.constant 9.99999974E-6 : f32
    %18 = vector.broadcast %cst_11 : f32 to vector<1x8x1xf32>
    %19 = arith.addf %17, %18 : vector<1x8x1xf32>
    %20 = math.rsqrt %19 : vector<1x8x1xf32>
    %21 = vector.broadcast %20 : vector<1x8x1xf32> to vector<1x8x32xf32>
    %22 = arith.mulf %12, %21 : vector<1x8x32xf32>
    %23 = vector.shape_cast %0 : vector<1x32xf32> to vector<1x1x32xf32>
    %24 = vector.broadcast %23 : vector<1x1x32xf32> to vector<1x8x32xf32>
    %25 = arith.mulf %22, %24 : vector<1x8x32xf32>
    %26 = vector.shape_cast %1 : vector<1x32xf32> to vector<1x1x32xf32>
    %27 = vector.broadcast %26 : vector<1x1x32xf32> to vector<1x8x32xf32>
    %28 = arith.addf %25, %27 : vector<1x8x32xf32>
    %29 = vector.shape_cast %4 : vector<1x32xf32> to vector<1x1x32xf32>
    %30 = vector.shape_cast %5 : vector<1x32xf32> to vector<1x1x32xf32>
    %31 = vector.broadcast %29 : vector<1x1x32xf32> to vector<1x8x32xf32>
    %32 = arith.mulf %31, %28 : vector<1x8x32xf32>
    %cst_12 = arith.constant 0.000000e+00 : f32
    %33 = vector.broadcast %cst_12 : f32 to vector<1x8x32xf32>
    %34 = arith.maximumf %32, %33 : vector<1x8x32xf32>
    %35 = vector.broadcast %30 : vector<1x1x32xf32> to vector<1x8x32xf32>
    %36 = arith.mulf %35, %28 : vector<1x8x32xf32>
    %cst_13 = arith.constant 0.000000e+00 : f32
    %37 = vector.broadcast %cst_13 : f32 to vector<1x8x32xf32>
    %38 = arith.maximumf %36, %37 : vector<1x8x32xf32>
    %39 = arith.subf %34, %38 : vector<1x8x32xf32>
    %40 = vector.shape_cast %2 : vector<1x32xf32> to vector<1x1x32xf32>
    %41 = vector.broadcast %40 : vector<1x1x32xf32> to vector<1x8x32xf32>
    %42 = arith.mulf %39, %41 : vector<1x8x32xf32>
    %cst_14 = arith.constant dense<0.000000e+00> : vector<1x8xf32>
    %43 = vector.multi_reduction <add>, %42, %cst_14 [2] : vector<1x8x32xf32> to vector<1x8xf32>
    %44 = vector.shape_cast %43 : vector<1x8xf32> to vector<1x8x1xf32>
    %45 = arith.negf %44 : vector<1x8x1xf32>
    %46 = math.exp %45 : vector<1x8x1xf32>
    %cst_15 = arith.constant 1.000000e+00 : f32
    %47 = vector.broadcast %cst_15 : f32 to vector<1x8x1xf32>
    %48 = arith.addf %47, %46 : vector<1x8x1xf32>
    %49 = arith.divf %47, %48 : vector<1x8x1xf32>
    %50 = arith.subf %29, %30 : vector<1x1x32xf32>
    %51 = vector.broadcast %49 : vector<1x8x1xf32> to vector<1x8x32xf32>
    %52 = vector.broadcast %50 : vector<1x1x32xf32> to vector<1x8x32xf32>
    %53 = arith.mulf %51, %52 : vector<1x8x32xf32>
    %54 = vector.broadcast %30 : vector<1x1x32xf32> to vector<1x8x32xf32>
    %55 = arith.addf %54, %53 : vector<1x8x32xf32>
    %c0_16 = arith.constant 0 : index
    %c0_17 = arith.constant 0 : index
    %c0_18 = arith.constant 0 : index
    %56 = vector.load %arg4[%c0_16, %c0_17, %c0_18] : memref<1x8x32xf32, #tpu.memory_space<vmem>>, vector<1x8x32xf32>
    tpu.vector_store %arg4[%c0_16, %c0_17, %c0_18], %55 {strides = array<i32>} : memref<1x8x32xf32, #tpu.memory_space<vmem>>, vector<1x8x32xf32>,
    return
  }
  func.func @transform_0(%arg0: i32) -> (i32, i32) {
    %c0_i32 = arith.constant 0 : i32
    %c0_i32_0 = arith.constant 0 : i32
    %c0_i32_1 = arith.constant 0 : i32
    return %c0_i32, %c0_i32_0 : i32, i32
  }
  func.func @transform_1(%arg0: i32) -> (i32, i32) {
    %c0_i32 = arith.constant 0 : i32
    %c0_i32_0 = arith.constant 0 : i32
    return %arg0, %c0_i32 : i32, i32
  }
  func.func @transform_2(%arg0: i32) -> (i32, i32, i32) {
    %c0_i32 = arith.constant 0 : i32
    %c0_i32_0 = arith.constant 0 : i32
    %c0_i32_1 = arith.constant 0 : i32
    return %arg0, %c0_i32, %c0_i32_0 : i32, i32, i32
  }
  func.func @transform_3(%arg0: i32) -> (i32, i32, i32) {
    %c0_i32 = arith.constant 0 : i32
    %c0_i32_0 = arith.constant 0 : i32
    %c0_i32_1 = arith.constant 0 : i32
    return %arg0, %c0_i32, %c0_i32_0 : i32, i32, i32
  }
}

</mosaic_0001>

<bundles_post_ra>
// kernel: tpu_custom_call.1
= control target key start
LH: loop header
LB: loop body
LE: loop exit
PB: predicated region body
PF: predicated region fallthrough
CT: control target
= control target key end

     0   :  { %8 = vsyncpa [#allocation3], 0  ;;  %s296_s0 = inlined_call_operand.hbm [shape: f32[8,32], index: 0, kind: input, shape index: {}]   ;;  %s297_s1 = inlined_call_operand.vmem [shape: f32[1,64], index: 1, kind: input, shape index: {}]   ;;  %s298_s2 = inlined_call_operand.hbm [shape: f32[1,8,32], index: 2, kind: input, shape index: {}]   ;;  %s299_s3 = inlined_call_operand.hbm [shape: f32[1,8,32], index: 3, kind: output, shape index: {}]  }
   0x1   :  { %9 = vsyncpa [#allocation6], 0 }
   0x2   :  { %10 = vsyncpa [#allocation4], 0  ;;  %s226_s12 = smov [#allocation2]   ;;  %s227_s14 = smov [#allocation5]  }
   0x3   :  { %s17_s13 = sshll.u32 %s226_s12, 4  ;;  %s29_s15 = sshll.u32 %s227_s14, 4  ;;  %s18_s13 = int_to_ptr.vmem [resolvable:$true] %s17_s13  ;;  %s30_s15 = int_to_ptr.vmem [resolvable:$true] %s29_s15 }
   0x4   :  { %s154_s18 = scalar_lea.hbm %s296_s0, 128 }
   0x5   :  { %p155_p0 = scmp.ne.s32.totalorder %s296_s0, %s154_s18  ;;  %p158_p1 = scmp.lt.u32.totalorder %s154_s18, %s296_s0 }
   0x7   :  { %p160_p2 = pnand %p158_p1, %p155_p0 }
   0x9   :  { %163 = shalt.err (!%p160_p2)
}
   0xa   :  { %s164_s23 = scalar_lea.vmem %s18_s13, 128  ;;  %p169_p4 = scmp.lt.s32.totalorder %s18_s13, %s18_s13 }
   0xb   :  { %p165_p3 = scmp.ne.s32.totalorder %s18_s13, %s164_s23  ;;  %p170_p5 = scmp.lt.s32.totalorder %s164_s23, %s164_s23 }
   0xd   :  { %p171_p6 = por %p170_p5, %p169_p4 }
   0xf   :  { %p172_p7 = pnand %p171_p6, %p165_p3 }
  0x11   :  { %175 = shalt.err (!%p172_p7)
}
  0x12   :  { %20 = dma.hbm_to_vmem [thread:$0]  %s296_s0, 128, %s18_s13, [#allocation3]  }
  0x13   :  { %s176_s28 = scalar_lea.hbm %s298_s2, 128 }
  0x14   :  { %p177_p8 = scmp.ne.s32.totalorder %s298_s2, %s176_s28  ;;  %p180_p9 = scmp.lt.u32.totalorder %s176_s28, %s298_s2 }
  0x16   :  { %p182_p10 = pnand %p180_p9, %p177_p8 }
  0x18   :  { %185 = shalt.err (!%p182_p10)
}
  0x19   :  { %s186_s6 = scalar_lea.vmem %s30_s15, 128  ;;  %p191_p12 = scmp.lt.s32.totalorder %s30_s15, %s30_s15 }
  0x1a   :  { %p187_p11 = scmp.ne.s32.totalorder %s30_s15, %s186_s6  ;;  %p192_p13 = scmp.lt.s32.totalorder %s186_s6, %s186_s6 }
  0x1c   :  { %p193_p0 = por %p192_p13, %p191_p12 }
  0x1e   :  { %p194_p1 = pnand %p193_p0, %p187_p11 }
  0x20   :  { %197 = shalt.err (!%p194_p1)
}
  0x21   :  { %32 = dma.hbm_to_vmem [thread:$0]  %s298_s2, 128, %s30_s15, [#allocation6]  }
  0x22   :  { %220 = dma.done.wait [#allocation3], 128  }
  0x23   :  { %221 = vsyncadd [#allocation3], 4294967168 }
  0x24   :  { %222 = dma.done.wait [#allocation6], 128  }
  0x25   :  { %223 = vsyncadd [#allocation6], 4294967168  ;;  %vm44_vm0 = vcmask 261120   ;;  %v43_v0 = vld [vmem:[#allocation5] sm:$0xff]  ;;  %v139_v11 = vld [vmem:[#allocation2] ss:$0 sm:$0xff]  ;;  %v70_v16 = vlaneseq }
  0x26   :  { %v45_v1 = vsel %vm44_vm0, %v43_v0, 0.0  ;;  %v140_v13 = vld [vmem:[#allocation2 + $0x1] ss:$0 sm:$0xff]  ;;  %s228_s2 = smov 32   ;;  %v42_v19 = vld [vmem:[%s297_s1] sm:$0x1] }
  0x27   :  { %46 = vadd.xlane.f32.xlu0 %v45_v1  ;;  %v71_v17 = vshrl.u32 %v70_v16, 7  ;;  %s229_s10 = smov 96   ;;  %v141_v27 = vld [vmem:[#allocation2 + $0x2] ss:$0 sm:$0xff]  ;;  %s230_s1 = smov [#allocation7]  }
  0x28   :  { %s129_s11 = sshll.u32 %s230_s1, 4  ;;  %s130_s11 = int_to_ptr.vmem [resolvable:$true] %s129_s11 }
  0x29   :  { %v72_v18 = vsub.s32 0, %v71_v17  ;;  %s198_s12 = scalar_lea.vmem %s130_s11, 128  ;;  %p203_p3 = scmp.lt.s32.totalorder %s130_s11, %s130_s11 }
  0x2a   :  { %p199_p2 = scmp.ne.s32.totalorder %s130_s11, %s198_s12  ;;  %p204_p4 = scmp.lt.s32.totalorder %s198_s12, %s198_s12 }
  0x2b   :  { %v73_v20 = vrot.slane %v42_v19, %v72_v18 }
  0x2c   :  { %p205_p5 = por %p204_p4, %p203_p3 }
  0x2e   :  { %p206_p6 = pnand %p205_p5, %p199_p2 }
  0xb4   :  { %v47_v2 = vpop.xlane.xlu0 %46 }
  0xb5   :  { %v49_v3 = vmul.f32 0.03125, %v47_v2 }
  0xb7   :  { %v50_v4 = vsub.f32 %v43_v0, %v49_v3 }
  0xb9   :  { %v51_v5 = vmul.f32 %v50_v4, %v50_v4 }
  0xbb   :  { %v52_v6 = vsel %vm44_vm0, %v51_v5, 0.0 }
  0xbc   :  { %53 = vadd.xlane.f32.xlu0 %v52_v6 }
 0x149   :  { %v54_v7 = vpop.xlane.xlu0 %53 }
 0x14a   :  { %v55_v8 = vmul.f32 0.03125, %v54_v7 }
 0x14c   :  { %v56_v9 = vadd.f32 1e-05, %v55_v8 }
 0x14e   :  { %148 = vrsqrt.f32 %v56_v9 }
 0x158   :  { %v149_v10 = vpop.eup %148 }
 0x159   :  { %v58_v12 = vmul.f32 %v149_v10, %v50_v4 }
 0x15b   :  { %v63_v14 = vmul.f32 %v139_v11, %v58_v12 }
 0x15d   :  { %v68_v15 = vadd.f32 %v140_v13, %v63_v14 }
 0x15f   :  { %78 = vrot.lane.b32.xlu1 %v68_v15, %s228_s2  ;;  %v75_v24 = vmul.f32 %v73_v20, %v68_v15 }
 0x161   :  { %v76_v25 = vmax.f32 %v75_v24, 0.0 }
 0x1d1   :  { %v79_v21 = vpop.permute.xlu1 %78 }
 0x1d2   :  { %v81_v22 = vmul.f32 %v79_v21, %v73_v20 }
 0x1d4   :  { %v82_v23 = vmax.f32 %v81_v22, 0.0 }
 0x1d6   :  { %84 = vrot.lane.b32.xlu1 %v82_v23, %s229_s10 }
 0x1da   :  { %102 = vrot.lane.b32.xlu1 %v42_v19, %s229_s10 }
 0x248   :  { %v85_v26 = vpop.permute.xlu1 %84 }
 0x249   :  { %v87_v28 = vsub.f32 %v76_v25, %v85_v26 }
 0x24b   :  { %v92_v29 = vmul.f32 %v141_v27, %v87_v28 }
 0x24c   :  { %v103_v35 = vpop.permute.xlu1 %102 }
 0x24d   :  { %v93_v30 = vsel %vm44_vm0, %v92_v29, 0.0  ;;  %v105_v36 = vsub.f32 %v42_v19, %v103_v35 }
 0x24e   :  { %94 = vadd.xlane.f32.xlu0 %v93_v30 }
 0x24f   :  { %v110_v37 = vrot.slane %v105_v36, %v72_v18 }
 0x2db   :  { %v95_v31 = vpop.xlane.xlu0 %94 }
 0x2dc   :  { %v142_v32 = vmul.f32 -1.442695, %v95_v31 }
 0x2de   :  { %150 = vpow2.f32 %v142_v32 }
 0x2e8   :  { %v151_v33 = vpop.eup %150 }
 0x2e9   :  { %v99_v34 = vadd.f32 1.0, %v151_v33 }
 0x2eb   :  { %152 = vrcp.f32 %v99_v34 }
 0x2f5   :  { %v153_v38 = vpop.eup %152 }
 0x2f6   :  { %v112_v39 = vmul.f32 %v153_v38, %v110_v37 }
 0x2f8   :  { %114 = vrot.lane.b32.xlu0 %v112_v39, %s228_s2 }
 0x36a   :  { %v115_v40 = vpop.permute.xlu0 %114 }
 0x36b   :  { %v117_v41 = vadd.f32 %v115_v40, %v73_v20 }
 0x36d   :  { %119 = vrot.lane.b32.xlu1 %v117_v41, %s229_s10 }
 0x3df   :  { %v120_v42 = vpop.permute.xlu1 %119 }
 0x3e0   :  { %122 = vst.msk [vmem:[#allocation7] sm:$0xff] %vm44_vm0, %v120_v42 }
 0x3e1   :  { %209 = shalt.err (!%p206_p6)
}
 0x3e2   :  { %s210_s15 = scalar_lea.hbm %s299_s3, 128 }
 0x3e3   :  { %p211_p7 = scmp.ne.s32.totalorder %s299_s3, %s210_s15  ;;  %p214_p8 = scmp.lt.u32.totalorder %s210_s15, %s299_s3 }
 0x3e5   :  { %p216_p9 = pnand %p214_p8, %p211_p7 }
 0x3e7   :  { %219 = shalt.err (!%p216_p9)
}
 0x3e8   :  { %132 = dma.vmem_to_hbm [thread:$0]  %s130_s11, 128, %s299_s3, [#allocation4]  }
 0x3e9   :  { %224 = dma.done.wait [#allocation4], 128  }
 0x3ea   :  { %225 = vsyncadd [#allocation4], 4294967168 }
 0x3eb   :  { %136 = vsyncpa [#allocation3], 1 }
 0x3ec   :  { %137 = vsyncpa [#allocation6], 1 }
 0x3ed   :  { %138 = vsyncpa [#allocation4], 1 }

</bundles_post_ra>
